<compile_context>
chip_gen: v7x
topology: tpu7x:2x2x1
jax: 0.10.0
libtpu: 0.0.40
codegen_flags: <defaults>
</compile_context>

<pallas_src>
import jax
import jax.numpy as jnp
from jax.experimental import pallas as pl
from jax.experimental.pallas import tpu as pltpu


_LANE = 128
_MIB = 1 << 20


def _cdiv(a, b):
    return -(-a // b)


def _round_down(a, b):
    return (a // b) * b


def _device_defaults():
    """Returns (n_split, block_budget_bytes, vmem_limit_bytes) per generation."""
    try:
        kind = jax.devices()[0].device_kind.lower()
    except Exception:
        kind = ""
    if "v7" in kind:
        # 2 TensorCores / chip, only 64 MiB VMEM per core: shard the batch
        # across cores, keep the block budget + limit well under 64 MiB.
        return 2, 36 * _MIB, 52 * _MIB
    if "v6" in kind or "v5e" in kind or "lite" in kind:
        # Single TensorCore, 128 MiB physical VMEM.
        return 1, 48 * _MIB, 96 * _MIB
    if "v4" in kind or "v5" in kind:
        # Megacore generations (2 TCs sharing the chip).
        return 2, 40 * _MIB, 80 * _MIB
    if "v2" in kind or "v3" in kind:
        return 1, 6 * _MIB, 12 * _MIB
    # Unknown backend (e.g. interpret mode): conservative defaults.
    return 1, 24 * _MIB, 48 * _MIB


# ----------------------------------------------------------------------------
# Kernel factory: batch-tiled partial-sum reduction (loss, optionally + KLD)
# ----------------------------------------------------------------------------
def _make_loss_kernel(loss_type, with_kld):
    def kernel(*refs):
        if with_kld:
            recon_ref, x_ref, mu_ref, logvar_ref, out_ref, acc_ref, kacc_ref = refs
        else:
            recon_ref, x_ref, out_ref, acc_ref = refs
            kacc_ref = None

        i = pl.program_id(1)   # batch-tile (reduction) axis

        @pl.when(i == 0)
        def _():
            acc_ref[...] = jnp.zeros_like(acc_ref)
            if with_kld:
                kacc_ref[...] = jnp.zeros_like(kacc_ref)

        r = recon_ref[...].astype(jnp.float32)
        t = x_ref[...].astype(jnp.float32)

        # Per-row contribution (tile_b, 1); the lane reduce lands on the XLU,
        # an idle VLIW slot in this HBM-bound kernel.
        if loss_type == "Multinomial":
            # sum_d -(log_softmax(r)*t) == lse*sum(t) - sum(r*t)   per row
            m = jnp.max(r, axis=-1, keepdims=True)
            lse = jnp.log(jnp.sum(jnp.exp(r - m), axis=-1, keepdims=True)) + m
            row = (lse * jnp.sum(t, axis=-1, keepdims=True)
                   - jnp.sum(r * t, axis=-1, keepdims=True))
        elif loss_type == "Gaussian":
            d = r - t
            row = jnp.sum(d * d, axis=-1, keepdims=True)
        else:  # "Logistic"
            # Numerically stable BCE-with-logits form; equals
            # binary_cross_entropy(sigmoid(r), t) up to PyTorch's log clamp at
            # -100 (only differs at extreme saturation).
            e = jnp.maximum(r, 0.0) - r * t + jnp.log1p(jnp.exp(-jnp.abs(r)))
            row = jnp.sum(e, axis=-1, keepdims=True)

        acc_ref[...] += row

        if with_kld:
            mu = mu_ref[...].astype(jnp.float32)
            lv = logvar_ref[...].astype(jnp.float32)
            kacc_ref[...] += jnp.sum(1.0 + lv - mu * mu - jnp.exp(lv),
                                     axis=-1, keepdims=True)

        @pl.when(i == pl.num_programs(1) - 1)
        def _():
            lane = jax.lax.broadcasted_iota(jnp.int32, (1, 8, _LANE), 2)
            vec = jnp.where(lane == 0, jnp.sum(acc_ref[...]), 0.0)
            if with_kld:
                vec = jnp.where(lane == 1, jnp.sum(kacc_ref[...]), vec)
            out_ref[...] = vec

    return kernel


# ----------------------------------------------------------------------------
# Plain-JAX sums (tiny-batch fallback + ragged-tail remainder)
# ----------------------------------------------------------------------------
def _jax_sums(loss_type, recon_x, x, mu=None, logvar=None):
    r = recon_x.astype(jnp.float32)
    t = x.astype(jnp.float32)
    if loss_type == "Multinomial":
        loss = -jnp.sum(jax.nn.log_softmax(r, axis=-1) * t)
    elif loss_type == "Gaussian":
        loss = jnp.sum((r - t) ** 2)
    else:  # Logistic
        loss = jnp.sum(jnp.maximum(r, 0.0) - r * t
                       + jnp.log1p(jnp.exp(-jnp.abs(r))))
    kld = None
    if mu is not None:
        m = mu.astype(jnp.float32)
        lv = logvar.astype(jnp.float32)
        kld = jnp.sum(1.0 + lv - m * m - jnp.exp(lv))
    return loss, kld


# ----------------------------------------------------------------------------
# Launcher: returns (sum of per-row loss terms, sum of KLD terms or None)
# ----------------------------------------------------------------------------
def _partial_sums(loss_type, recon_x, x, mu=None, logvar=None, *,
                  n_split=None, max_tile_b=8192,
                  block_budget_bytes=None, vmem_limit_bytes=None):
    with_kld = mu is not None
    B, D = x.shape

    d_split, d_budget, d_limit = _device_defaults()
    if n_split is None:
        n_split = d_split
    if block_budget_bytes is None:
        block_budget_bytes = d_budget
    if vmem_limit_bytes is None:
        vmem_limit_bytes = d_limit

    arrays = [recon_x, x]
    widths = [D, D]
    if with_kld:
        L = mu.shape[1]
        arrays += [mu, logvar]
        widths += [L, L]

    itemsizes = [jnp.dtype(a.dtype).itemsize for a in arrays]
    # 16-row tile granularity if any input is 16-bit (bf16 sublane packing).
    gran = 16 if any(sz < 4 for sz in itemsizes) else 8

    # Tiny batch: nothing worth launching a kernel for.
    if B < gran:
        return _jax_sums(loss_type, recon_x, x, mu, logvar)

    # Only split across cores if every core gets at least one row granule.
    n_split_eff = n_split if (B // n_split) >= gran else 1

    # VMEM per batch row: each input is double-buffered by the pipeline;
    # the per-row f32 accumulators are negligible (tile_b x 1 each).
    per_row = sum(2 * w * sz for w, sz in zip(widths, itemsizes)) + 8
    tile_by_vmem = max(gran, _round_down(block_budget_bytes // per_row, gran))
    rows_per_core = _round_down(B // n_split_eff, gran)
    tile_b = int(max(gran, min(tile_by_vmem, max_tile_b, rows_per_core)))

    n_inner = B // (n_split_eff * tile_b)         # whole tiles per core (>= 1)
    rows_main = n_split_eff * n_inner * tile_b    # rows covered by the kernel

    kernel = _make_loss_kernel(loss_type, with_kld)

    in_specs = [pl.BlockSpec((tile_b, w),
                             lambda c, i, _n=n_inner: (c * _n + i, 0))
                for w in widths]
    scratch = [pltpu.VMEM((tile_b, 1), jnp.float32)]
    if with_kld:
        scratch.append(pltpu.VMEM((tile_b, 1), jnp.float32))

    # Cost hint for the XLA scheduler (memory-bound reduction).
    bytes_accessed = (rows_main * sum(w * sz for w, sz in zip(widths, itemsizes))
                      + n_split_eff * 8 * _LANE * 4)
    if loss_type == "Multinomial":
        transcendentals = rows_main * (D + 1)
        flops = 6 * rows_main * D
    elif loss_type == "Logistic":
        transcendentals = 2 * rows_main * D
        flops = 6 * rows_main * D
    else:
        transcendentals = 0
        flops = 3 * rows_main * D
    if with_kld:
        transcendentals += rows_main * widths[-1]
        flops += 5 * rows_main * widths[-1]

    out = pl.pallas_call(
        kernel,
        out_shape=jax.ShapeDtypeStruct((n_split_eff, 8, _LANE), jnp.float32),
        grid_spec=pltpu.PrefetchScalarGridSpec(
            num_scalar_prefetch=0,
            grid=(n_split_eff, n_inner),
            in_specs=in_specs,
            out_specs=pl.BlockSpec((1, 8, _LANE), lambda c, i: (c, 0, 0)),
            scratch_shapes=scratch,
        ),
        compiler_params=pltpu.CompilerParams(
            dimension_semantics=("parallel", "arbitrary"),
            vmem_limit_bytes=vmem_limit_bytes,
        ),
        cost_estimate=pl.CostEstimate(
            flops=int(flops),
            transcendentals=int(transcendentals),
            bytes_accessed=int(bytes_accessed)),
    )(*arrays)

    loss_sum = jnp.sum(out[:, 0, 0])
    kld_sum = jnp.sum(out[:, 0, 1]) if with_kld else None

    # Ragged tail (< n_split_eff*tile_b rows): fold with a plain-JAX reduction
    # instead of padding (avoids a full HBM copy of the inputs).
    if rows_main < B:
        t_loss, t_kld = _jax_sums(
            loss_type, recon_x[rows_main:], x[rows_main:],
            mu[rows_main:] if with_kld else None,
            logvar[rows_main:] if with_kld else None)
        loss_sum = loss_sum + t_loss
        if with_kld:
            kld_sum = kld_sum + t_kld

    return loss_sum, kld_sum


# ----------------------------------------------------------------------------
# LossFunc (mirrors the PyTorch module's forward)
# ----------------------------------------------------------------------------
class LossFuncPallas:
    def __init__(self, loss_type="Multinomial", model_type=None,
                 n_core_splits=None, max_tile_b=8192):
        self.loss_type = loss_type
        self.model_type = model_type
        self.n_core_splits = n_core_splits   # None -> auto (per TPU generation)
        self.max_tile_b = max_tile_b

    def __call__(self, recon_x=None, x=None, mu=None, logvar=None, anneal=None):
        if self.loss_type not in ("Multinomial", "Logistic", "Gaussian"):
            raise Exception("Not correct loss_type!")

        B, D = x.shape
        with_kld = self.model_type == "VAE"

        loss_sum, kld_sum = _partial_sums(
            self.loss_type, recon_x, x,
            mu=mu if with_kld else None,
            logvar=logvar if with_kld else None,
            n_split=self.n_core_splits, max_tile_b=self.max_tile_b)

        if self.loss_type == "Gaussian":
            loss = loss_sum / (B * D)            # mse_loss: mean over elements
        else:                                    # Multinomial / Logistic:
            loss = loss_sum / B                  # sum over features, mean over batch

        if with_kld:
            kld = -0.5 * kld_sum / mu.shape[0]
            loss = loss + anneal * kld
        return loss


# ----------------------------------------------------------------------------
# Pure-JAX references (for correctness check)
# ----------------------------------------------------------------------------
def _ref_multinomial(recon_x, x):
    logp = jax.nn.log_softmax(recon_x, axis=1)
    return -jnp.mean(jnp.sum(logp * x, axis=-1))


def _ref_gaussian(recon_x, x):
    return jnp.mean((recon_x - x) ** 2)


def _ref_logistic(recon_x, x):
    p = jax.nn.sigmoid(recon_x)
    bce = -(x * jnp.log(p) + (1.0 - x) * jnp.log(1.0 - p))
    return jnp.mean(jnp.sum(bce, axis=1))


def _ref_kld(mu, logvar):
    return -0.5 * jnp.mean(jnp.sum(1 + logvar - mu**2 - jnp.exp(logvar), axis=1))


if __name__ == "__main__":
    key = jax.random.PRNGKey(0)
    k1, k2, k3, k4 = jax.random.split(key, 4)

    B, D, L = 16, 128, 32   # batch, feature dim, latent dim
    recon_x = jax.random.normal(k1, (B, D), dtype=jnp.float32)
    x = jax.random.uniform(k2, (B, D), dtype=jnp.float32)
    mu = 0.1 * jax.random.normal(k3, (B, L), dtype=jnp.float32)
    logvar = 0.1 * jax.random.normal(k4, (B, L), dtype=jnp.float32)
    anneal = 0.2

    # Default module config: loss_type='Multinomial', model_type=None
    out_m = jax.block_until_ready(
        LossFuncPallas("Multinomial")(recon_x=recon_x, x=x))
    assert jnp.allclose(out_m, _ref_multinomial(recon_x, x), rtol=1e-4, atol=1e-4)

    out_g = jax.block_until_ready(
        LossFuncPallas("Gaussian")(recon_x=recon_x, x=x))
    assert jnp.allclose(out_g, _ref_gaussian(recon_x, x), rtol=1e-4, atol=1e-4)

    out_l = jax.block_until_ready(
        LossFuncPallas("Logistic")(recon_x=recon_x, x=x))
    assert jnp.allclose(out_l, _ref_logistic(recon_x, x), rtol=1e-4, atol=1e-4)

    # VAE branch (KLD fused into the same kernel)
    out_vae = jax.block_until_ready(
        LossFuncPallas("Multinomial", model_type="VAE")(
            recon_x=recon_x, x=x, mu=mu, logvar=logvar, anneal=anneal))
    ref_vae = _ref_multinomial(recon_x, x) + anneal * _ref_kld(mu, logvar)
    assert jnp.allclose(out_vae, ref_vae, rtol=1e-4, atol=1e-4)

    # Ragged batch (exercises tile-aligned prefix + plain-JAX tail, no padding)
    Br = 13
    rxr, xr = recon_x[:Br], x[:Br]
    out_rm = jax.block_until_ready(LossFuncPallas("Multinomial")(recon_x=rxr, x=xr))
    assert jnp.allclose(out_rm, _ref_multinomial(rxr, xr), rtol=1e-4, atol=1e-4)
    out_rl = jax.block_until_ready(LossFuncPallas("Logistic")(recon_x=rxr, x=xr))
    assert jnp.allclose(out_rl, _ref_logistic(rxr, xr), rtol=1e-4, atol=1e-4)
    out_rg = jax.block_until_ready(LossFuncPallas("Gaussian")(recon_x=rxr, x=xr))
    assert jnp.allclose(out_rg, _ref_gaussian(rxr, xr), rtol=1e-4, atol=1e-4)

    # Ragged VAE batch
    out_rvae = jax.block_until_ready(
        LossFuncPallas("Multinomial", model_type="VAE")(
            recon_x=rxr, x=xr, mu=mu[:Br], logvar=logvar[:Br], anneal=anneal))
    ref_rvae = _ref_multinomial(rxr, xr) + anneal * _ref_kld(mu[:Br], logvar[:Br])
    assert jnp.allclose(out_rvae, ref_rvae, rtol=1e-4, atol=1e-4)

    # Tiny batch (< tile granularity): plain-JAX fallback path
    Bt = 5
    out_tiny = jax.block_until_ready(
        LossFuncPallas("Gaussian")(recon_x=recon_x[:Bt], x=x[:Bt]))
    assert jnp.allclose(out_tiny, _ref_gaussian(recon_x[:Bt], x[:Bt]),
                        rtol=1e-4, atol=1e-4)

    print("KERNEL_OK")
</pallas_src>

<mosaic_0001>
module attributes {stable_mosaic.version = 11 : i64} {
  func.func @kernel(%arg0: i32, %arg1: i32, %arg2: memref<16x128xf32, #tpu.memory_space<vmem>>, %arg3: memref<16x128xf32, #tpu.memory_space<vmem>>, %arg4: memref<1x8x128xf32, #tpu.memory_space<vmem>>, %arg5: memref<16x1xf32, #tpu.memory_space<vmem>>) attributes {dimension_semantics = [#tpu.dimension_semantics<parallel>, #tpu.dimension_semantics<arbitrary>], iteration_bounds = array<i64: 1, 1>, scalar_prefetch = 0 : i64, scratch_operands = 1 : i64, tpu.core_type = #tpu.core_type<tc>, window_params = [{transform_indices = @transform_0, window_bounds = array<i64: 16, 128>}, {transform_indices = @transform_1, window_bounds = array<i64: 16, 128>}, {transform_indices = @transform_2, window_bounds = array<i64: 1, 8, 128>}]} {
    %c0_i32 = arith.constant 0 : i32
    %0 = arith.cmpi eq, %arg1, %c0_i32 : i32
    %1 = arith.extui %0 : i1 to i32
    %c0_i32_0 = arith.constant 0 : i32
    %2 = arith.cmpi ne, %1, %c0_i32_0 : i32
    scf.if %2 {
      %cst_13 = arith.constant 0.000000e+00 : f32
      %27 = vector.broadcast %cst_13 : f32 to vector<16x1xf32>
      %c0_14 = arith.constant 0 : index
      %c0_15 = arith.constant 0 : index
      %28 = vector.load %arg5[%c0_14, %c0_15] : memref<16x1xf32, #tpu.memory_space<vmem>>, vector<16x1xf32>
      tpu.vector_store %arg5[%c0_14, %c0_15], %27 {strides = array<i32>} : memref<16x1xf32, #tpu.memory_space<vmem>>, vector<16x1xf32>,
    } else {
    }
    %c0 = arith.constant 0 : index
    %c0_1 = arith.constant 0 : index
    %3 = vector.load %arg2[%c0, %c0_1] : memref<16x128xf32, #tpu.memory_space<vmem>>, vector<16x128xf32>
    %c0_2 = arith.constant 0 : index
    %c0_3 = arith.constant 0 : index
    %4 = vector.load %arg3[%c0_2, %c0_3] : memref<16x128xf32, #tpu.memory_space<vmem>>, vector<16x128xf32>
    %cst = arith.constant dense<0xFF800000> : vector<16xf32>
    %5 = vector.multi_reduction <maximumf>, %3, %cst [1] : vector<16x128xf32> to vector<16xf32>
    %6 = vector.shape_cast %5 : vector<16xf32> to vector<16x1xf32>
    %7 = vector.broadcast %6 : vector<16x1xf32> to vector<16x128xf32>
    %8 = arith.subf %3, %7 : vector<16x128xf32>
    %9 = math.exp %8 : vector<16x128xf32>
    %cst_4 = arith.constant dense<0.000000e+00> : vector<16xf32>
    %10 = vector.multi_reduction <add>, %9, %cst_4 [1] : vector<16x128xf32> to vector<16xf32>
    %11 = vector.shape_cast %10 : vector<16xf32> to vector<16x1xf32>
    %12 = math.log %11 : vector<16x1xf32>
    %13 = arith.addf %12, %6 : vector<16x1xf32>
    %cst_5 = arith.constant dense<0.000000e+00> : vector<16xf32>
    %14 = vector.multi_reduction <add>, %4, %cst_5 [1] : vector<16x128xf32> to vector<16xf32>
    %15 = vector.shape_cast %14 : vector<16xf32> to vector<16x1xf32>
    %16 = arith.mulf %13, %15 : vector<16x1xf32>
    %17 = arith.mulf %3, %4 : vector<16x128xf32>
    %cst_6 = arith.constant dense<0.000000e+00> : vector<16xf32>
    %18 = vector.multi_reduction <add>, %17, %cst_6 [1] : vector<16x128xf32> to vector<16xf32>
    %19 = vector.shape_cast %18 : vector<16xf32> to vector<16x1xf32>
    %20 = arith.subf %16, %19 : vector<16x1xf32>
    %c0_7 = arith.constant 0 : index
    %c0_8 = arith.constant 0 : index
    %21 = vector.load %arg5[%c0_7, %c0_8] : memref<16x1xf32, #tpu.memory_space<vmem>>, vector<16x1xf32>
    %22 = arith.addf %21, %20 : vector<16x1xf32>
    %c0_9 = arith.constant 0 : index
    %c0_10 = arith.constant 0 : index
    %23 = vector.load %arg5[%c0_9, %c0_10] : memref<16x1xf32, #tpu.memory_space<vmem>>, vector<16x1xf32>
    tpu.vector_store %arg5[%c0_9, %c0_10], %22 {strides = array<i32>} : memref<16x1xf32, #tpu.memory_space<vmem>>, vector<16x1xf32>,
    %c0_i32_11 = arith.constant 0 : i32
    %24 = arith.cmpi eq, %arg1, %c0_i32_11 : i32
    %25 = arith.extui %24 : i1 to i32
    %c0_i32_12 = arith.constant 0 : i32
    %26 = arith.cmpi ne, %25, %c0_i32_12 : i32
    scf.if %26 {
      %27 = tpu.iota {dimensions = array<i32: 2>} : vector<1x8x128xi32>
      %c0_i32_13 = arith.constant 0 : i32
      %28 = vector.broadcast %c0_i32_13 : i32 to vector<1x8x128xi32>
      %29 = arith.cmpi eq, %27, %28 : vector<1x8x128xi32>
      %c0_14 = arith.constant 0 : index
      %c0_15 = arith.constant 0 : index
      %30 = vector.load %arg5[%c0_14, %c0_15] : memref<16x1xf32, #tpu.memory_space<vmem>>, vector<16x1xf32>
      %31 = vector.shape_cast %30 : vector<16x1xf32> to vector<1x16x1xf32>
      %cst_16 = arith.constant dense<0.000000e+00> : vector<1xf32>
      %32 = vector.multi_reduction <add>, %31, %cst_16 [1, 2] : vector<1x16x1xf32> to vector<1xf32>
      %33 = vector.shape_cast %32 : vector<1xf32> to vector<1x1x1xf32>
      %34 = vector.extract %33[0, 0, 0] : f32 from vector<1x1x1xf32>
      %cst_17 = arith.constant 0.000000e+00 : f32
      %35 = vector.broadcast %34 : f32 to vector<1x8x128xf32>
      %36 = vector.broadcast %cst_17 : f32 to vector<1x8x128xf32>
      %37 = arith.select %29, %35, %36 : vector<1x8x128xi1>, vector<1x8x128xf32>
      %c0_18 = arith.constant 0 : index
      %c0_19 = arith.constant 0 : index
      %c0_20 = arith.constant 0 : index
      %38 = vector.load %arg4[%c0_18, %c0_19, %c0_20] : memref<1x8x128xf32, #tpu.memory_space<vmem>>, vector<1x8x128xf32>
      tpu.vector_store %arg4[%c0_18, %c0_19, %c0_20], %37 {strides = array<i32>} : memref<1x8x128xf32, #tpu.memory_space<vmem>>, vector<1x8x128xf32>,
    } else {
    }
    return
  }
  func.func @transform_0(%arg0: i32, %arg1: i32) -> (i32, i32) {
    %c1_i32 = arith.constant 1 : i32
    %0 = arith.muli %arg0, %c1_i32 : i32
    %1 = arith.addi %0, %arg1 : i32
    %c0_i32 = arith.constant 0 : i32
    %c0_i32_0 = arith.constant 0 : i32
    return %1, %c0_i32 : i32, i32
  }
  func.func @transform_1(%arg0: i32, %arg1: i32) -> (i32, i32) {
    %c1_i32 = arith.constant 1 : i32
    %0 = arith.muli %arg0, %c1_i32 : i32
    %1 = arith.addi %0, %arg1 : i32
    %c0_i32 = arith.constant 0 : i32
    %c0_i32_0 = arith.constant 0 : i32
    return %1, %c0_i32 : i32, i32
  }
  func.func @transform_2(%arg0: i32, %arg1: i32) -> (i32, i32, i32) {
    %c0_i32 = arith.constant 0 : i32
    %c0_i32_0 = arith.constant 0 : i32
    %c0_i32_1 = arith.constant 0 : i32
    return %arg0, %c0_i32, %c0_i32_0 : i32, i32, i32
  }
}

</mosaic_0001>

<bundles_post_ra>
// kernel: tpu_custom_call.1
= control target key start
LH: loop header
LB: loop body
LE: loop exit
PB: predicated region body
PF: predicated region fallthrough
CT: control target
= control target key end

     0   :  { %7 = vsyncpa [#allocation4], 0  ;;  %s294_s0 = inlined_call_operand.hbm [shape: f32[16,128], index: 0, kind: input, shape index: {}]   ;;  %s295_s1 = inlined_call_operand.hbm [shape: f32[16,128], index: 1, kind: input, shape index: {}]   ;;  %s296_s2 = inlined_call_operand.hbm [shape: f32[1,8,128], index: 2, kind: output, shape index: {}]  }
   0x1   :  { %8 = vsyncpa [#allocation7], 0 }
   0x2   :  { %9 = vsyncpa [#allocation5], 0  ;;  %s231_s9 = smov [#allocation3]   ;;  %s159_s13 = scalar_lea.hbm %s294_s0, 256 }
   0x3   :  { %s19_s10 = sshll.u32 %s231_s9, 4  ;;  %p160_p0 = scmp.ne.s32.totalorder %s294_s0, %s159_s13  ;;  %s20_s10 = int_to_ptr.vmem [resolvable:$true] %s19_s10 }
   0x4   :  { %p163_p1 = scmp.lt.u32.totalorder %s159_s13, %s294_s0 }
   0x6   :  { %p165_p2 = pnand %p163_p1, %p160_p0 }
   0x8   :  { %168 = shalt.err (!%p165_p2)
}
   0x9   :  { %s169_s18 = scalar_lea.vmem %s20_s10, 256  ;;  %p174_p4 = scmp.lt.s32.totalorder %s20_s10, %s20_s10 }
   0xa   :  { %p170_p3 = scmp.ne.s32.totalorder %s20_s10, %s169_s18  ;;  %p175_p5 = scmp.lt.s32.totalorder %s169_s18, %s169_s18 }
   0xc   :  { %p176_p6 = por %p175_p5, %p174_p4 }
   0xe   :  { %p177_p7 = pnand %p176_p6, %p170_p3 }
  0x10   :  { %180 = shalt.err (!%p177_p7)
}
  0x11   :  { %s232_s19 = smov 128   ;;  %s233_s20 = smov 8  }
  0x12   :  { %25 = dma.hbm_to_vmem [thread:$0]  %s294_s0, 256, %s20_s10, [#allocation4], %s232_s19, %s232_s19, %s233_s20  }
  0x13   :  { %s234_s23 = smov [#allocation6]   ;;  %s181_s27 = scalar_lea.hbm %s295_s1, 256 }
  0x14   :  { %s35_s24 = sshll.u32 %s234_s23, 4  ;;  %p182_p8 = scmp.ne.s32.totalorder %s295_s1, %s181_s27  ;;  %s36_s24 = int_to_ptr.vmem [resolvable:$true] %s35_s24 }
  0x15   :  { %p185_p9 = scmp.lt.u32.totalorder %s181_s27, %s295_s1 }
  0x17   :  { %p187_p10 = pnand %p185_p9, %p182_p8 }
  0x19   :  { %190 = shalt.err (!%p187_p10)
}
  0x1a   :  { %s191_s4 = scalar_lea.vmem %s36_s24, 256  ;;  %p196_p12 = scmp.lt.s32.totalorder %s36_s24, %s36_s24 }
  0x1b   :  { %p192_p11 = scmp.ne.s32.totalorder %s36_s24, %s191_s4  ;;  %p197_p13 = scmp.lt.s32.totalorder %s191_s4, %s191_s4 }
  0x1d   :  { %p198_p0 = por %p197_p13, %p196_p12 }
  0x1f   :  { %p199_p1 = pnand %p198_p0, %p192_p11 }
  0x21   :  { %202 = shalt.err (!%p199_p1)
}
  0x22   :  { %41 = dma.hbm_to_vmem [thread:$0]  %s295_s1, 256, %s36_s24, [#allocation7], %s232_s19, %s232_s19, %s233_s20  }
  0x23   :  { %225 = dma.done.wait [#allocation4], 256  }
  0x24   :  { %226 = vsyncadd [#allocation4], 4294967040 }
  0x25   :  { %227 = dma.done.wait [#allocation7], 256  }
  0x26   :  { %228 = vsyncadd [#allocation7], 4294967040  ;;  %v59_v0 = vld [vmem:[#allocation3] sm:$0xff]  ;;  %v60_v1 = vld [vmem:[#allocation3 + $0x8] sm:$0xff]  ;;  %vm56_vm0 = vcmask 7168   ;;  %v235_v14 = vmov 0.0   ;;  %v107_v47 = vlaneseq }
  0x27   :  { %63 = vmax.xlane.f32.xlu0 %v59_v0  ;;  %v61_v2 = vld [vmem:[#allocation6] sm:$0xff]  ;;  %v62_v12 = vld [vmem:[#allocation6 + $0x8] sm:$0xff]  ;;  %57 = vst.msk [vmem:[#allocation2] sm:$0xff] %vm56_vm0, %v235_v14  ;;  %58 = vst.msk [vmem:[#allocation2 + $0x8] sm:$0xff] %vm56_vm0, %v235_v14  ;;  %s236_s1 = smov [#allocation8]  }
  0x28   :  { %v89_v3 = vmul.f32 %v61_v2, %v59_v0  ;;  %v90_v13 = vmul.f32 %v62_v12, %v60_v1  ;;  %v108_v48 = vand.u32 127, %v107_v47  ;;  %s133_s6 = sshll.u32 %s236_s1, 4  ;;  %s134_s6 = int_to_ptr.vmem [resolvable:$true] %s133_s6 }
  0x29   :  { %s203_s8 = scalar_lea.vmem %s134_s6, 128  ;;  %p208_p3 = scmp.lt.s32.totalorder %s134_s6, %s134_s6 }
  0x2a   :  { %vm109_vm1 = vcmp.eq.s32.totalorder %v108_v48, 0  ;;  %p204_p2 = scmp.ne.s32.totalorder %s134_s6, %s203_s8  ;;  %p209_p4 = scmp.lt.s32.totalorder %s203_s8, %s203_s8 }
  0x2b   :  { %65 = vmax.xlane.f32.xlu0 %v60_v1 }
  0x2c   :  { %p210_p5 = por %p209_p4, %p208_p3 }
  0x2e   :  { %v97_v26 = vld [vmem:[#allocation2] sm:$0xff]  ;;  %v98_v32 = vld [vmem:[#allocation2 + $0x8] sm:$0xff]  ;;  %p211_p6 = pnand %p210_p5, %p204_p2 }
  0x2f   :  { %83 = vadd.xlane.f32.xlu0 %v61_v2 }
  0x33   :  { %91 = vadd.xlane.f32.xlu0 %v89_v3 }
  0xb4   :  { %v64_v4 = vpop.xlane.xlu0 %63 }
  0xb5   :  { %v67_v5 = vsub.f32 %v59_v0, %v64_v4 }
  0xb7   :  { %v69_v6 = vmul.f32 1.442695, %v67_v5 }
  0xb8   :  { %v66_v7 = vpop.xlane.xlu0 %65 }
  0xb9   :  { %v68_v8 = vsub.f32 %v60_v1, %v66_v7  ;;  %151 = vpow2.f32 %v69_v6 }
  0xbb   :  { %v71_v9 = vmul.f32 1.442695, %v68_v8 }
  0xbc   :  { %v84_v17 = vpop.xlane.xlu0 %83 }
  0xbd   :  { %153 = vpow2.f32 %v71_v9 }
  0xc0   :  { %v92_v23 = vpop.xlane.xlu0 %91 }
  0xc3   :  { %v152_v10 = vpop.eup %151 }
  0xc4   :  { %73 = vadd.xlane.f32.xlu1 %v152_v10 }
  0xc7   :  { %v154_v11 = vpop.eup %153 }
  0xc8   :  { %75 = vadd.xlane.f32.xlu1 %v154_v11 }
  0xcc   :  { %85 = vadd.xlane.f32.xlu1 %v62_v12 }
  0xd0   :  { %93 = vadd.xlane.f32.xlu1 %v90_v13 }
 0x151   :  { %v74_v15 = vpop.xlane.xlu1 %73 }
 0x152   :  { %155 = vlog2.f32 %v74_v15 }
 0x155   :  { %v76_v16 = vpop.xlane.xlu1 %75 }
 0x156   :  { %157 = vlog2.f32 %v76_v16 }
 0x159   :  { %v86_v20 = vpop.xlane.xlu1 %85 }
 0x15c   :  { %v156_v18 = vpop.eup %155 }
 0x15d   :  { %v78_v19 = vmul.f32 0.6931472, %v156_v18  ;;  %v94_v29 = vpop.xlane.xlu1 %93 }
 0x15f   :  { %v81_v21 = vadd.f32 %v78_v19, %v64_v4 }
 0x160   :  { %v158_v22 = vpop.eup %157 }
 0x161   :  { %v80_v24 = vmul.f32 0.6931472, %v158_v22  ;;  %v87_v25 = vmul.f32 %v84_v17, %v81_v21 }
 0x163   :  { %v82_v27 = vadd.f32 %v80_v24, %v66_v7  ;;  %v95_v28 = vsub.f32 %v87_v25, %v92_v23 }
 0x165   :  { %v88_v30 = vmul.f32 %v86_v20, %v82_v27  ;;  %v99_v31 = vadd.f32 %v97_v26, %v95_v28 }
 0x167   :  { %102 = vst.msk [vmem:[#allocation2] sm:$0xff] %vm56_vm0, %v99_v31  ;;  %v96_v33 = vsub.f32 %v88_v30, %v94_v29 }
 0x169   :  { %v100_v34 = vadd.f32 %v98_v32, %v96_v33 }
 0x16b   :  { %103 = vst.msk [vmem:[#allocation2 + $0x8] sm:$0xff] %vm56_vm0, %v100_v34 }
 0x16e   :  { %v110_v35 = vld [vmem:[#allocation2] sm:$0xff] }
 0x16f   :  { %v112_v37 = vsel %vm56_vm0, %v110_v35, 0.0 }
 0x172   :  { %v111_v36 = vld [vmem:[#allocation2 + $0x8] sm:$0xff] }
 0x173   :  { %v113_v38 = vsel %vm56_vm0, %v111_v36, 0.0 }
 0x174   :  { %v114_v39 = vadd.f32 %v113_v38, %v112_v37 }
 0x176   :  { %115 = vadd.xlane.f32.xlu0 %v114_v39 }
 0x203   :  { %v116_v40 = vpop.xlane.xlu0 %115 }
 0x204   :  { %v117_v41 = vrot.slane %v116_v40, 4 }
 0x206   :  { %v118_v42 = vadd.f32 %v117_v41, %v116_v40 }
 0x208   :  { %v119_v43 = vrot.slane %v118_v42, 2 }
 0x20a   :  { %v120_v44 = vadd.f32 %v119_v43, %v118_v42 }
 0x20c   :  { %v121_v45 = vrot.slane %v120_v44, 1 }
 0x20e   :  { %v122_v46 = vadd.f32 %v121_v45, %v120_v44 }
 0x210   :  { %143 = vpush %v122_v46 }
 0x241   :  { %s144_s7 = spop %143 }
 0x242   :  { %v124_v49 = vstv %s144_s7 }
 0x243   :  { %v125_v50 = vsel %vm109_vm1, %v124_v49, 0.0 }
 0x244   :  { %126 = vst [vmem:[#allocation8] sm:$0xff] %v125_v50 }
 0x245   :  { %214 = shalt.err (!%p211_p6)
}
 0x246   :  { %s215_s11 = scalar_lea.hbm %s296_s2, 128 }
 0x247   :  { %p216_p7 = scmp.ne.s32.totalorder %s296_s2, %s215_s11  ;;  %p219_p8 = scmp.lt.u32.totalorder %s215_s11, %s296_s2 }
 0x249   :  { %p221_p9 = pnand %p219_p8, %p216_p7 }
 0x24b   :  { %224 = shalt.err (!%p221_p9)
}
 0x24c   :  { %136 = dma.vmem_to_hbm [thread:$0]  %s134_s6, 128, %s296_s2, [#allocation5]  }
 0x24d   :  { %229 = dma.done.wait [#allocation5], 128  }
 0x24e   :  { %230 = vsyncadd [#allocation5], 4294967168 }
 0x24f   :  { %140 = vsyncpa [#allocation4], 1 }
 0x250   :  { %141 = vsyncpa [#allocation7], 1 }
 0x251   :  { %142 = vsyncpa [#allocation5], 1 }

</bundles_post_ra>
